<compile_context>
chip_gen: v5e
topology: v5e:2x2
jax: 0.10.0
libtpu: 0.0.40
codegen_flags: <defaults>
</compile_context>

<pallas_src>
import jax
import jax.numpy as jnp
import numpy as np
from jax import lax
from jax.experimental import pallas as pl
from jax.experimental.pallas import tpu as pltpu


def _residual_block_kernel(xp_ref, wa_ref, wb_ref, b1_ref, b2_ref, out_ref, mid_ref):
    # xp_ref : (B*Hp, WC)  f32  stacked row-padded, width-channel-packed input images
    # wa_ref : (3*WC, WC)  bf16 stage-1 block-banded Toeplitz weights, ky concatenated
    #                           along K, BN1 scale folded into the columns
    # wb_ref : (3*WC, WC)  bf16 stage-2 weights (BN2 scale folded)
    # b1_ref : (1, WC)     f32  BN1 shift
    # b2_ref : (1, WC)     f32  BN2 shift
    # out_ref: (B*H, WC)   f32  lane-dense output
    # mid_ref: (B*Hp, WC)  f32  VMEM scratch: stacked, row-padded stage-1 activation
    BHp, WC = xp_ref.shape
    BH, _ = out_ref.shape
    B = (BHp - BH) // 2            # images per grid step (static)
    H = BH // B
    Hp = H + 2
    Mp = BHp - 2                   # conv-output rows in the stacked layout
    w_dtype = wa_ref.dtype

    # ---- stage 1: conv1 (BN1 scale folded into weights) + shift + ReLU -----------
    # Single dot: LHS = [rows m | rows m+1 | rows m+2] concatenated along K.
    lhs1 = jnp.concatenate(
        [xp_ref[0:Mp, :], xp_ref[1:1 + Mp, :], xp_ref[2:2 + Mp, :]],
        axis=1).astype(w_dtype)                                    # (Mp, 3*WC)
    acc1 = jnp.dot(lhs1, wa_ref[...], preferred_element_type=jnp.float32)
    y1 = jnp.maximum(acc1 + b1_ref[...], 0.0)                      # (Mp, WC) f32
    # Rows that straddle image boundaries land exactly on the inter-image padding
    # rows of the stacked layout; zero them so stage 2 sees exact zero row padding.
    row = lax.broadcasted_iota(jnp.int32, (Mp, WC), 0)
    y1 = jnp.where((row % Hp) < H, y1, 0.0)

    # Rebuild the stacked, row-padded stage-1 activation (f32 scratch, 8-row tiles).
    mid_ref[0:1, :] = jnp.zeros((1, WC), dtype=mid_ref.dtype)
    mid_ref[BHp - 1:BHp, :] = jnp.zeros((1, WC), dtype=mid_ref.dtype)
    mid_ref[1:1 + Mp, :] = y1

    # ---- stage 2: conv2 (BN2 scale folded) + shift + residual + ReLU -------------
    lhs2 = jnp.concatenate(
        [mid_ref[0:Mp, :], mid_ref[1:1 + Mp, :], mid_ref[2:2 + Mp, :]],
        axis=1).astype(w_dtype)                                    # (Mp, 3*WC)
    acc2 = jnp.dot(lhs2, wb_ref[...], preferred_element_type=jnp.float32)
    res = xp_ref[1:1 + Mp, :]                                      # f32 residual (center rows)
    z = jnp.maximum(acc2 + b2_ref[...] + res, 0.0)                 # (Mp, WC) f32

    # Scatter the H valid rows of each image to the lane-dense output.
    for b in range(B):
        out_ref[b * H:(b + 1) * H, :] = z[b * Hp:b * Hp + H, :]


def _block_toeplitz(w, W):
    """Fold the 3 kx taps of a 3x3 'same' conv into per-ky block-banded matmul weights.

    w: (Cout, Cin, 3, 3) torch OIHW conv weight -> (3, W*Cin, W*Cout) f32 such that,
    for a row-padded (NO column padding) width-channel-packed buffer X of shape
    (Hp, W*Cin):   conv_out_packed[h, :] = sum_ky  X[h + ky, :] @ result[ky].
    Boundary kx taps are clipped (zero band entries), so no column halo is needed.
    """
    Cout, Cin, KH, KW = w.shape
    xi = jnp.arange(W)[:, None]        # input  width position (band rows)
    xo = jnp.arange(W)[None, :]        # output width position (band cols)
    mats = []
    for ky in range(KH):
        A = jnp.zeros((W, Cin, W, Cout), jnp.float32)
        for kx in range(KW):
            sel = (xi == xo + (kx - 1)).astype(jnp.float32)             # (W, W) band
            blk = jnp.transpose(w[:, :, ky, kx]).astype(jnp.float32)    # (Cin, Cout)
            A = A + sel[:, None, :, None] * blk[None, :, None, :]
        mats.append(A.reshape(W * Cin, W * Cout))
    return jnp.stack(mats)             # (3, W*Cin, W*Cout)


def _fold_bn(bn, eps):
    gamma, beta, mean, var = bn
    scale = gamma / jnp.sqrt(var + eps)
    shift = beta - mean * scale
    return scale.astype(jnp.float32), shift.astype(jnp.float32)


def _pick_images_per_step(N, H, Hp):
    """Images per grid step: push the dot's M towards ~128 rows while keeping >=2 grid
    steps (megacore + DMA overlap) and keeping block sublane dims multiples of 8 (or
    covering the full array)."""
    def legal(B):
        return N % B == 0 and (B == N or ((B * Hp) % 8 == 0 and (B * H) % 8 == 0))
    upper = min(max(1, 128 // max(H, 1)), max(N // 2, 1))
    for B in range(upper, 0, -1):
        if legal(B):
            return B
    return N   # single full-batch step fallback (blocks cover the whole array -> legal)


def residual_block_forward(x_nchw, w1, w2, bn1, bn2, eps=1e-5, mxu_dtype=jnp.bfloat16):
    """x_nchw: (N, C, H, W) f32; w*: (C, C, 3, 3) torch OIHW layout;
       bn* = (gamma, beta, running_mean, running_var), each (C,). Inference-mode BN."""
    N, C, H, W = x_nchw.shape
    Hp = H + 2
    WC = W * C

    # NCHW -> NHWC, zero-pad rows only, pack width+channels into the lane axis and
    # stack all padded images along rows: (N*Hp, W*C), f32 (kernel casts to bf16).
    # TODO(synk): keep activations in this packed layout across the surrounding model
    #             to avoid the transpose/pad round-trips per block.
    x = jnp.transpose(x_nchw, (0, 2, 3, 1)).astype(jnp.float32)
    xp = jnp.pad(x, ((0, 0), (1, 1), (0, 0), (0, 0)))
    xp2 = xp.reshape(N * Hp, WC)

    # Block-banded (Toeplitz) conv weights over the UNPADDED width, BN scale folded
    # into the output columns, 3 ky taps concatenated along K -> one (3*WC, WC) matmul
    # operand per stage. Only the f32 shifts remain as separate kernel operands.
    s1, b1 = _fold_bn(bn1, eps)
    s2, b2 = _fold_bn(bn2, eps)
    wa = (_block_toeplitz(w1, W) * jnp.tile(s1, W)[None, None, :]
          ).reshape(3 * WC, WC).astype(mxu_dtype)
    wb = (_block_toeplitz(w2, W) * jnp.tile(s2, W)[None, None, :]
          ).reshape(3 * WC, WC).astype(mxu_dtype)
    b1t = jnp.tile(b1, W).reshape(1, WC)
    b2t = jnp.tile(b2, W).reshape(1, WC)

    B = _pick_images_per_step(N, H, Hp)
    grid = (N // B,)

    # VMEM budget: double-buffered input/output blocks + resident weights + scratch + slack.
    in_blk = B * Hp * WC * 4
    out_blk = B * H * WC * 4
    w_bytes = 2 * (3 * WC) * WC * 2
    mid_blk = B * Hp * WC * 4
    vmem_limit = int(min(max(2 * (in_blk + out_blk) + 2 * w_bytes + mid_blk + (8 << 20),
                             16 << 20), 48 << 20))

    out2 = pl.pallas_call(
        _residual_block_kernel,
        out_shape=jax.ShapeDtypeStruct((N * H, WC), jnp.float32),
        grid=grid,
        in_specs=[
            pl.BlockSpec((B * Hp, WC), lambda g: (g, 0)),     # stacked padded input block
            pl.BlockSpec((3 * WC, WC), lambda g: (0, 0)),     # stage-1 weights (resident)
            pl.BlockSpec((3 * WC, WC), lambda g: (0, 0)),     # stage-2 weights (resident)
            pl.BlockSpec((1, WC), lambda g: (0, 0)),          # BN1 shift
            pl.BlockSpec((1, WC), lambda g: (0, 0)),          # BN2 shift
        ],
        out_specs=pl.BlockSpec((B * H, WC), lambda g: (g, 0)),
        scratch_shapes=[pltpu.VMEM((B * Hp, WC), jnp.float32)],
        compiler_params=pltpu.CompilerParams(
            dimension_semantics=("parallel",),                # v7x: split steps over 2 TCs
            vmem_limit_bytes=vmem_limit),
    )(xp2, wa, wb, b1t, b2t)

    # (N*H, W*C) -> (N, H, W, C) -> NCHW
    return jnp.transpose(out2.reshape(N, H, W, C), (0, 3, 1, 2))


def residual_block_reference(x, w1, w2, bn1, bn2, eps=1e-5):
    def conv_bn(x, w, bn):
        gamma, beta, mean, var = bn
        y = lax.conv_general_dilated(x, w, window_strides=(1, 1), padding='SAME',
                                     dimension_numbers=('NCHW', 'OIHW', 'NCHW'))
        scale = (gamma / jnp.sqrt(var + eps))[None, :, None, None]
        shift = (beta - mean * gamma / jnp.sqrt(var + eps))[None, :, None, None]
        return y * scale + shift
    y = jax.nn.relu(conv_bn(x, w1, bn1))
    z = conv_bn(y, w2, bn2) + x
    return jax.nn.relu(z)


if __name__ == "__main__":
    N, C, H, W = 8, 8, 16, 16          # num_filters = 8 -> W*C = 128 (lane-dense)
    key = jax.random.PRNGKey(0)
    (kx_, kw1, kw2,
     kg1, kb1_, km1, kv1,
     kg2, kb2_, km2, kv2) = jax.random.split(key, 11)

    x = jax.random.normal(kx_, (N, C, H, W), jnp.float32)
    w1 = 0.1 * jax.random.normal(kw1, (C, C, 3, 3), jnp.float32)
    w2 = 0.1 * jax.random.normal(kw2, (C, C, 3, 3), jnp.float32)
    bn1 = (1.0 + 0.1 * jax.random.normal(kg1, (C,), jnp.float32),
           0.1 * jax.random.normal(kb1_, (C,), jnp.float32),
           0.1 * jax.random.normal(km1, (C,), jnp.float32),
           0.5 + jax.random.uniform(kv1, (C,), jnp.float32))
    bn2 = (1.0 + 0.1 * jax.random.normal(kg2, (C,), jnp.float32),
           0.1 * jax.random.normal(kb2_, (C,), jnp.float32),
           0.1 * jax.random.normal(km2, (C,), jnp.float32),
           0.5 + jax.random.uniform(kv2, (C,), jnp.float32))

    out = jax.block_until_ready(residual_block_forward(x, w1, w2, bn1, bn2))
    ref = residual_block_reference(x, w1, w2, bn1, bn2)

    assert out.shape == x.shape and out.dtype == jnp.float32
    # Loose tolerance accounts for bf16 MXU inputs (f32 accumulate) vs. the f32 reference.
    np.testing.assert_allclose(np.asarray(out), np.asarray(ref), rtol=5e-2, atol=5e-2)
    print("KERNEL_OK")
</pallas_src>

<mosaic_0001>
module attributes {stable_mosaic.version = 11 : i64} {
  func.func @_residual_block_kernel(%arg0: i32, %arg1: memref<72x128xf32, #tpu.memory_space<vmem>>, %arg2: memref<384x128xbf16, #tpu.memory_space<vmem>>, %arg3: memref<384x128xbf16, #tpu.memory_space<vmem>>, %arg4: memref<1x128xf32, #tpu.memory_space<vmem>>, %arg5: memref<1x128xf32, #tpu.memory_space<vmem>>, %arg6: memref<64x128xf32, #tpu.memory_space<vmem>>, %arg7: memref<72x128xf32, #tpu.memory_space<vmem>>) attributes {dimension_semantics = [#tpu.dimension_semantics<parallel>], iteration_bounds = array<i64: 2>, scalar_prefetch = 0 : i64, scratch_operands = 1 : i64, tpu.core_type = #tpu.core_type<tc>, window_params = [{transform_indices = @transform_0, window_bounds = array<i64: 72, 128>}, {pipeline_mode = #tpu.pipeline_mode<synchronous>, transform_indices = @transform_1, window_bounds = array<i64: 384, 128>}, {pipeline_mode = #tpu.pipeline_mode<synchronous>, transform_indices = @transform_2, window_bounds = array<i64: 384, 128>}, {pipeline_mode = #tpu.pipeline_mode<synchronous>, transform_indices = @transform_3, window_bounds = array<i64: 1, 128>}, {pipeline_mode = #tpu.pipeline_mode<synchronous>, transform_indices = @transform_4, window_bounds = array<i64: 1, 128>}, {transform_indices = @transform_5, window_bounds = array<i64: 64, 128>}]} {
    %c0 = arith.constant 0 : index
    %c0_0 = arith.constant 0 : index
    %0 = vector.load %arg1[%c0, %c0_0] : memref<72x128xf32, #tpu.memory_space<vmem>>, vector<70x128xf32>
    %c1 = arith.constant 1 : index
    %c0_1 = arith.constant 0 : index
    %1 = vector.load %arg1[%c1, %c0_1] : memref<72x128xf32, #tpu.memory_space<vmem>>, vector<70x128xf32>
    %c2 = arith.constant 2 : index
    %c0_2 = arith.constant 0 : index
    %2 = vector.load %arg1[%c2, %c0_2] : memref<72x128xf32, #tpu.memory_space<vmem>>, vector<70x128xf32>
    %3 = tpu.concatenate %0, %1, %2 in 1 : vector<70x128xf32>, vector<70x128xf32>, vector<70x128xf32> -> vector<70x384xf32>
    %4 = arith.truncf %3 : vector<70x384xf32> to vector<70x384xbf16>
    %c0_3 = arith.constant 0 : index
    %c0_4 = arith.constant 0 : index
    %5 = vector.load %arg2[%c0_3, %c0_4] : memref<384x128xbf16, #tpu.memory_space<vmem>>, vector<384x128xbf16>
    %cst = arith.constant dense<0.000000e+00> : vector<70x128xf32>
    %6 = tpu.matmul %4, %5, %cst {dimension_numbers = #tpu.dot_dimension_numbers<[1], [0], [0], [1], [0, 0, 1, 1], [], []>} : vector<70x384xbf16>, vector<384x128xbf16>, vector<70x128xf32> -> vector<70x128xf32>
    %c0_5 = arith.constant 0 : index
    %c0_6 = arith.constant 0 : index
    %7 = vector.load %arg4[%c0_5, %c0_6] : memref<1x128xf32, #tpu.memory_space<vmem>>, vector<1x128xf32>
    %8 = vector.broadcast %7 : vector<1x128xf32> to vector<70x128xf32>
    %9 = arith.addf %6, %8 : vector<70x128xf32>
    %cst_7 = arith.constant 0.000000e+00 : f32
    %10 = vector.broadcast %cst_7 : f32 to vector<70x128xf32>
    %11 = arith.maximumf %9, %10 : vector<70x128xf32>
    %12 = tpu.iota {dimensions = array<i32: 0>} : vector<70x128xi32>
    %c18_i32 = arith.constant 18 : i32
    %c0_i32 = arith.constant 0 : i32
    %13 = arith.cmpi eq, %c18_i32, %c0_i32 : i32
    %c1_i32 = arith.constant 1 : i32
    %14 = arith.select %13, %c1_i32, %c18_i32 : i32
    %15 = vector.broadcast %14 : i32 to vector<70x128xi32>
    %16 = arith.remsi %12, %15 : vector<70x128xi32>
    %c0_i32_8 = arith.constant 0 : i32
    %17 = vector.broadcast %c0_i32_8 : i32 to vector<70x128xi32>
    %18 = arith.cmpi ne, %16, %17 : vector<70x128xi32>
    %c0_i32_9 = arith.constant 0 : i32
    %19 = vector.broadcast %c0_i32_9 : i32 to vector<70x128xi32>
    %20 = arith.cmpi slt, %16, %19 : vector<70x128xi32>
    %c0_i32_10 = arith.constant 0 : i32
    %21 = arith.cmpi slt, %14, %c0_i32_10 : i32
    %22 = vector.broadcast %21 : i1 to vector<70x128xi1>
    %23 = vector.broadcast %22 : vector<70x128xi1> to vector<70x128xi1>
    %24 = arith.xori %20, %23 : vector<70x128xi1>
    %25 = arith.andi %24, %18 : vector<70x128xi1>
    %26 = vector.broadcast %14 : i32 to vector<70x128xi32>
    %27 = arith.addi %16, %26 : vector<70x128xi32>
    %28 = arith.select %25, %27, %16 : vector<70x128xi1>, vector<70x128xi32>
    %c16_i32 = arith.constant 16 : i32
    %29 = vector.broadcast %c16_i32 : i32 to vector<70x128xi32>
    %30 = arith.cmpi slt, %28, %29 : vector<70x128xi32>
    %cst_11 = arith.constant 0.000000e+00 : f32
    %31 = vector.broadcast %cst_11 : f32 to vector<70x128xf32>
    %32 = arith.select %30, %11, %31 : vector<70x128xi1>, vector<70x128xf32>
    %cst_12 = arith.constant 0.000000e+00 : f32
    %33 = vector.broadcast %cst_12 : f32 to vector<1x128xf32>
    %c0_13 = arith.constant 0 : index
    %c0_14 = arith.constant 0 : index
    %34 = vector.load %arg7[%c0_13, %c0_14] : memref<72x128xf32, #tpu.memory_space<vmem>>, vector<1x128xf32>
    tpu.vector_store %arg7[%c0_13, %c0_14], %33 {strides = array<i32>} : memref<72x128xf32, #tpu.memory_space<vmem>>, vector<1x128xf32>,
    %cst_15 = arith.constant 0.000000e+00 : f32
    %35 = vector.broadcast %cst_15 : f32 to vector<1x128xf32>
    %c71 = arith.constant 71 : index
    %c0_16 = arith.constant 0 : index
    %36 = vector.load %arg7[%c71, %c0_16] : memref<72x128xf32, #tpu.memory_space<vmem>>, vector<1x128xf32>
    tpu.vector_store %arg7[%c71, %c0_16], %35 {strides = array<i32>} : memref<72x128xf32, #tpu.memory_space<vmem>>, vector<1x128xf32>,
    %c1_17 = arith.constant 1 : index
    %c0_18 = arith.constant 0 : index
    %37 = vector.load %arg7[%c1_17, %c0_18] : memref<72x128xf32, #tpu.memory_space<vmem>>, vector<70x128xf32>
    tpu.vector_store %arg7[%c1_17, %c0_18], %32 {strides = array<i32>} : memref<72x128xf32, #tpu.memory_space<vmem>>, vector<70x128xf32>,
    %c0_19 = arith.constant 0 : index
    %c0_20 = arith.constant 0 : index
    %38 = vector.load %arg7[%c0_19, %c0_20] : memref<72x128xf32, #tpu.memory_space<vmem>>, vector<70x128xf32>
    %c1_21 = arith.constant 1 : index
    %c0_22 = arith.constant 0 : index
    %39 = vector.load %arg7[%c1_21, %c0_22] : memref<72x128xf32, #tpu.memory_space<vmem>>, vector<70x128xf32>
    %c2_23 = arith.constant 2 : index
    %c0_24 = arith.constant 0 : index
    %40 = vector.load %arg7[%c2_23, %c0_24] : memref<72x128xf32, #tpu.memory_space<vmem>>, vector<70x128xf32>
    %41 = tpu.concatenate %38, %39, %40 in 1 : vector<70x128xf32>, vector<70x128xf32>, vector<70x128xf32> -> vector<70x384xf32>
    %42 = arith.truncf %41 : vector<70x384xf32> to vector<70x384xbf16>
    %c0_25 = arith.constant 0 : index
    %c0_26 = arith.constant 0 : index
    %43 = vector.load %arg3[%c0_25, %c0_26] : memref<384x128xbf16, #tpu.memory_space<vmem>>, vector<384x128xbf16>
    %cst_27 = arith.constant dense<0.000000e+00> : vector<70x128xf32>
    %44 = tpu.matmul %42, %43, %cst_27 {dimension_numbers = #tpu.dot_dimension_numbers<[1], [0], [0], [1], [0, 0, 1, 1], [], []>} : vector<70x384xbf16>, vector<384x128xbf16>, vector<70x128xf32> -> vector<70x128xf32>
    %c1_28 = arith.constant 1 : index
    %c0_29 = arith.constant 0 : index
    %45 = vector.load %arg1[%c1_28, %c0_29] : memref<72x128xf32, #tpu.memory_space<vmem>>, vector<70x128xf32>
    %c0_30 = arith.constant 0 : index
    %c0_31 = arith.constant 0 : index
    %46 = vector.load %arg5[%c0_30, %c0_31] : memref<1x128xf32, #tpu.memory_space<vmem>>, vector<1x128xf32>
    %47 = vector.broadcast %46 : vector<1x128xf32> to vector<70x128xf32>
    %48 = arith.addf %44, %47 : vector<70x128xf32>
    %49 = arith.addf %48, %45 : vector<70x128xf32>
    %cst_32 = arith.constant 0.000000e+00 : f32
    %50 = vector.broadcast %cst_32 : f32 to vector<70x128xf32>
    %51 = arith.maximumf %49, %50 : vector<70x128xf32>
    %52 = vector.extract_strided_slice %51 {offsets = [0, 0], sizes = [16, 128], strides = [1, 1]} : vector<70x128xf32> to vector<16x128xf32>
    %c0_33 = arith.constant 0 : index
    %c0_34 = arith.constant 0 : index
    %53 = vector.load %arg6[%c0_33, %c0_34] : memref<64x128xf32, #tpu.memory_space<vmem>>, vector<16x128xf32>
    tpu.vector_store %arg6[%c0_33, %c0_34], %52 {strides = array<i32>} : memref<64x128xf32, #tpu.memory_space<vmem>>, vector<16x128xf32>,
    %54 = vector.extract_strided_slice %51 {offsets = [18, 0], sizes = [16, 128], strides = [1, 1]} : vector<70x128xf32> to vector<16x128xf32>
    %c16 = arith.constant 16 : index
    %c0_35 = arith.constant 0 : index
    %55 = vector.load %arg6[%c16, %c0_35] : memref<64x128xf32, #tpu.memory_space<vmem>>, vector<16x128xf32>
    tpu.vector_store %arg6[%c16, %c0_35], %54 {strides = array<i32>} : memref<64x128xf32, #tpu.memory_space<vmem>>, vector<16x128xf32>,
    %56 = vector.extract_strided_slice %51 {offsets = [36, 0], sizes = [16, 128], strides = [1, 1]} : vector<70x128xf32> to vector<16x128xf32>
    %c32 = arith.constant 32 : index
    %c0_36 = arith.constant 0 : index
    %57 = vector.load %arg6[%c32, %c0_36] : memref<64x128xf32, #tpu.memory_space<vmem>>, vector<16x128xf32>
    tpu.vector_store %arg6[%c32, %c0_36], %56 {strides = array<i32>} : memref<64x128xf32, #tpu.memory_space<vmem>>, vector<16x128xf32>,
    %58 = vector.extract_strided_slice %51 {offsets = [54, 0], sizes = [16, 128], strides = [1, 1]} : vector<70x128xf32> to vector<16x128xf32>
    %c48 = arith.constant 48 : index
    %c0_37 = arith.constant 0 : index
    %59 = vector.load %arg6[%c48, %c0_37] : memref<64x128xf32, #tpu.memory_space<vmem>>, vector<16x128xf32>
    tpu.vector_store %arg6[%c48, %c0_37], %58 {strides = array<i32>} : memref<64x128xf32, #tpu.memory_space<vmem>>, vector<16x128xf32>,
    return
  }
  func.func @transform_0(%arg0: i32) -> (i32, i32) {
    %c0_i32 = arith.constant 0 : i32
    %c0_i32_0 = arith.constant 0 : i32
    return %arg0, %c0_i32 : i32, i32
  }
  func.func @transform_1(%arg0: i32) -> (i32, i32) {
    %c0_i32 = arith.constant 0 : i32
    %c0_i32_0 = arith.constant 0 : i32
    %c0_i32_1 = arith.constant 0 : i32
    return %c0_i32, %c0_i32_0 : i32, i32
  }
  func.func @transform_2(%arg0: i32) -> (i32, i32) {
    %c0_i32 = arith.constant 0 : i32
    %c0_i32_0 = arith.constant 0 : i32
    %c0_i32_1 = arith.constant 0 : i32
    return %c0_i32, %c0_i32_0 : i32, i32
  }
  func.func @transform_3(%arg0: i32) -> (i32, i32) {
    %c0_i32 = arith.constant 0 : i32
    %c0_i32_0 = arith.constant 0 : i32
    %c0_i32_1 = arith.constant 0 : i32
    return %c0_i32, %c0_i32_0 : i32, i32
  }
  func.func @transform_4(%arg0: i32) -> (i32, i32) {
    %c0_i32 = arith.constant 0 : i32
    %c0_i32_0 = arith.constant 0 : i32
    %c0_i32_1 = arith.constant 0 : i32
    return %c0_i32, %c0_i32_0 : i32, i32
  }
  func.func @transform_5(%arg0: i32) -> (i32, i32) {
    %c0_i32 = arith.constant 0 : i32
    %c0_i32_0 = arith.constant 0 : i32
    return %arg0, %c0_i32 : i32, i32
  }
}

</mosaic_0001>

<bundles_post_ra>
// kernel: tpu_custom_call.1
= control target key start
LH: loop header
LB: loop body
LE: loop exit
PB: predicated region body
PF: predicated region fallthrough
CT: control target
= control target key end

     0   :  { %s2542_s0 = inlined_call_operand.hbm [shape: f32[144,128], index: 0, kind: input, shape index: {}]   ;;  %s2543_s1 = inlined_call_operand.hbm [shape: bf16[384,128], index: 1, kind: input, shape index: {}]   ;;  %s2544_s2 = inlined_call_operand.hbm [shape: bf16[384,128], index: 2, kind: input, shape index: {}]   ;;  %s2545_s3 = inlined_call_operand.vmem [shape: f32[1,128], index: 3, kind: input, shape index: {}]   ;;  %s2546_s4 = inlined_call_operand.vmem [shape: f32[1,128], index: 4, kind: input, shape index: {}]   ;;  %s2547_s5 = inlined_call_operand.hbm [shape: f32[128,128], index: 5, kind: output, shape index: {}]  }
   0x1   :  { %2548 = sst [smem:[#allocation13_spill]] %s2543_s1 }
   0x2   :  { %10 = vsyncpa [#allocation4], 0 }
   0x3   :  { %12 = vsyncpa [#allocation4 + $0x1], 0 }
   0x4   :  { %13 = vsyncpa [#allocation7], 0 }
   0x5   :  { %14 = vsyncpa [#allocation5], 0 }
   0x6   :  { %16 = vsyncpa [#allocation5 + $0x1], 0  ;;  %s2020_s18 = smov 0   ;;  %s2022_s19 = smov 0  }
   0x7   :  { %s2024_s20 = smov 0   ;;  %s2026_s21 = smov 0  }
   0x8 LB: > { %s2041_s22 = sadd.s32 4294967295, %s1978_s21   ;;  %s1454_s23 = sadd.s32 4294967294, %s1978_s21   ;;  %s1978_s21 = sphi %s2026_s21, %s2591_s21   ;;  %s1974_s20 = sphi %s2024_s20, %s2590_s20   ;;  %s1970_s19 = sphi %s2022_s19, %s2589_s19   ;;  %s1966_s18 = sphi %s2020_s18, %s2588_s18  }
   0x9   : > { %p42_p0 = scmp.ne.s32.totalorder %s1970_s19, %s1966_s18  ;;  %p43_p1 = scmp.eq.s32.totalorder %s2041_s22, 0 }
   0xa   : > { %p150_p2 = scmp.eq.s32.totalorder %s2041_s22, 1  ;;  %p156_p3 = scmp.eq.s32.totalorder %s1454_s23, 1 }
   0xb   : > { %p2050_p4 = por %p43_p1, %p42_p0  ;;  %p1455_p5 = scmp.ge.s32.totalorder %s1978_s21, 1 }
   0xc   : > { %p2055_p6 = por %p156_p3, %p42_p0  ;;  %p163_p7 = scmp.lt.s32.totalorder %s1978_s21, 3 }
   0xd   : > { %s2551_s1 = sld [smem:[#allocation13_spill]]  ;;  %s1980_s30 = smov [#allocation6]  }
   0xe   : > { %p2063_p8 = pnand %p1455_p5, %p163_p7  ;;  %s176_s6 = sshll.u32 %s1980_s30, 4  ;;  %s177_s6 = int_to_ptr.vmem [resolvable:$true] %s176_s6 }
   0xf   : > { %s188_s9 = sshll.u32 %s2544_s2, 4  ;;  %s1981_s10 = smov 64   ;;  %s189_s9 = int_to_ptr.hbm [resolvable:$true] %s188_s9 }
  0x10   : > { %p1741_p9 = pneg %p2063_p8  ;;  %s1982_s11 = smov 4  }
  0x11   : > { %s1983_s12 = smov [#allocation8]   ;;  %s2076_s14 = sadd.s32 1, %s1978_s21  }
  0x12   : > { %p1742_p10 = pnand %p1741_p9, %p43_p1  ;;  %s190_s13 = sshll.u32 %s1983_s12, 4  ;;  %s191_s13 = int_to_ptr.vmem [resolvable:$true] %s190_s13 }
  0x13   : > { %s174_s28 = sshll.u32 %s2551_s1, 4  ;;  %s29_s15 = sadd.s32 1, %s1974_s20  ;;  %s175_s28 = int_to_ptr.hbm [resolvable:$true] %s174_s28 }
  0x14   : > { %1744 = dma.hbm_to_vmem [thread:$0]  (!%p1742_p10), %s175_s28, 3072, %s177_s6, [#allocation7], %s1981_s10, %s1981_s10, %s1982_s11  }
  0x15   : > { %1747 = dma.hbm_to_vmem [thread:$0]  (!%p1742_p10), %s189_s9, 3072, %s191_s13, [#allocation7], %s1981_s10, %s1981_s10, %s1982_s11  }
  0x16   : > { %s26_s16 = ssub.s32 %s1978_s21, %s2076_s14  ;;  %p36_p12 = scmp.ne.s32.totalorder %s1974_s20, %s1970_s19 }
  0x17   : > { %p27_p13 = scmp.eq.s32.totalorder %s26_s16, 0  ;;  %p37_p0 = scmp.eq.s32.totalorder %s1978_s21, 0 }
  0x18   : > { %p2086_p3 = por %p150_p2, %p36_p12  ;;  %p1758_p5 = scmp.lt.s32.totalorder %s1978_s21, 2 }
  0x19   : > { %s2092_s23 = scalar_select %p27_p13, %s1974_s20, %s29_s15  }
  0x1a   : > { %p38_p7 = por %p37_p0, %p36_p12  ;;  %s210_s26 = sand.u32 1, %s1974_s20  }
  0x1b   : > { %s1727_s27 = smul.u32 72, %s210_s26  ;;  %s211_s12 = scalar_lea.sflag [#allocation4], %s210_s26 }
  0x1c   : > { %s1661_s28 = smul.u32 72, %s1978_s21  ;;  %p2096_p9 = pnand %p1758_p5, %p38_p7 }
  0x1d   : > { %s214_s9 = scalar_lea.vmem [#allocation3], %s1727_s27  ;;  %s1885_s6 = scalar_lea.hbm %s2542_s0, 144 }
  0x1e   : > { %s219_s8 = scalar_lea.hbm %s2542_s0, %s1661_s28  ;;  %s222_s10 = sshll.u32 %s214_s9, 4  ;;  %s223_s10 = int_to_ptr.vmem [resolvable:$true] %s222_s10 }
  0x1f   : > { %s220_s11 = sshll.u32 %s219_s8, 4  ;;  %p1882_p10 = pneg %p2096_p9  ;;  %s221_s11 = int_to_ptr.hbm [resolvable:$true] %s220_s11 }
  0x20   : > { %s1878_s13 = sshra.s32 %s221_s11, 4  ;;  %s1879_s13 = int_to_ptr.hbm [resolvable:$true] %s1878_s13 }
  0x21   : > { %s1880_s15 = scalar_lea.hbm %s1879_s13, 72  ;;  %p1886_p0 = scmp.lt.s32.totalorder %s1879_s13, %s2542_s0 }
  0x22   : > { %p1881_p2 = scmp.ne.s32.totalorder %s1879_s13, %s1880_s15  ;;  %p1887_p5 = scmp.lt.s32.totalorder %s1885_s6, %s1880_s15 }
  0x24   : > { %p1883_p12 = pnand %p1882_p10, %p1881_p2  ;;  %p1888_p7 = por %p1887_p5, %p1886_p0 }
  0x26   : > { %p1884_p13 = pneg %p1883_p12 }
  0x28   : > { %p1889_p11 = pnand %p1888_p7, %p1884_p13 }
  0x2a   : > { %1892 = shalt.err (!%p1889_p11)
}
  0x2b   : > { %s1984_s26 = smov 128   ;;  %s1985_s27 = smov 8  }
  0x2c   : > { %1751 = dma.hbm_to_vmem [thread:$0]  (!%p2096_p9), %s221_s11, 1152, %s223_s10, %s211_s12, %s1984_s26, %s1984_s26, %s1985_s27  }
  0x2d   : > { %234 = sbr.rel (%p2063_p8) target bundleno = 498 (0x1f2), region = 40  ;;  %s2116_s1 = sand.u32 (!%p2063_p8), 1, %s1970_s19  }
  0x2e   : > { %s1728_s8 = smul.u32 (!%p2063_p8), 72, %s2116_s1  ;;  %s237_s9 = scalar_lea.sflag (!%p2063_p8), [#allocation4], %s2116_s1 }
  0x30   : > { %s2120_s13 = scalar_lea.vmem (!%p2063_p8), [#allocation3], %s1728_s8 }
  0x32   : > { %1953 = dma.done.wait (%p2050_p4), %s237_s9, 1152  }
  0x33   : > { %1955 = vsyncadd (%p2050_p4), %s237_s9, 4294966144 }
  0x34   : > { %1957 = dma.done.wait (%p43_p1), [#allocation7], 6144  }
  0x35   : > { %1959 = vsyncadd (%p43_p1), [#allocation7], 4294961152  ;;  %v1669_v0 = vld [vmem:[#allocation6 + $0x38] sm:$0xff]  ;;  %v1668_v2 = vld [vmem:[#allocation6 + $0x30] sm:$0xff]  ;;  %s1463_s11 = sshll.u32 %s2116_s1, 6  ;;  %s1710_s15 = sshll.u32 %s2041_s22, 6 }
  0x36   : > { %v1677_v1 = vld [vmem:[#allocation6 + $0x78] sm:$0xff]  ;;  %1711 = vmatpush.bf16.msra.mxu2 %v1669_v0  ;;  %v1676_v3 = vld [vmem:[#allocation6 + $0x70] sm:$0xff]  ;;  %518 = vmatpush.bf16.msra.mxu0 %v1669_v0  ;;  %v1667_v4 = vld [vmem:[#allocation6 + $0x28] sm:$0xff]  ;;  %s2480_s12 = scalar_lea.vmem [#allocation9], %s1463_s11  ;;  %s1358_s7 = scalar_lea.hbm %s2547_s5, %s1710_s15 }
  0x37   : > { %1719 = vmatpush.bf16.msra.mxu3 %v1677_v1  ;;  %551 = vmatpush.bf16.msra.mxu1 %v1677_v1  ;;  %v1675_v5 = vld [vmem:[#allocation6 + $0x68] sm:$0xff]  ;;  %v1666_v6 = vld [vmem:[#allocation6 + $0x20] sm:$0xff]  ;;  %v1665_v8 = vld [vmem:[#allocation6 + $0x18] sm:$0xff]  ;;  %s1359_s28 = sshll.u32 %s2480_s12, 4  ;;  %s1361_s26 = sshll.u32 %s1358_s7, 4  ;;  %s1360_s28 = int_to_ptr.vmem [resolvable:$true] %s1359_s28  ;;  %s1362_s26 = int_to_ptr.hbm [resolvable:$true] %s1361_s26 }
  0x38   : > { %v1674_v7 = vld [vmem:[#allocation6 + $0x60] sm:$0xff]  ;;  %v1673_v9 = vld [vmem:[#allocation6 + $0x58] sm:$0xff]  ;;  %v1664_v10 = vld [vmem:[#allocation6 + $0x10] sm:$0xff]  ;;  %s1347_s22 = scalar_lea.sflag [#allocation5], %s2116_s1  ;;  %s1922_s27 = sshra.s32 %s1362_s26, 4  ;;  %s1923_s27 = int_to_ptr.hbm [resolvable:$true] %s1922_s27 }
  0x39   : > { %v1672_v11 = vld [vmem:[#allocation6 + $0x50] sm:$0xff]  ;;  %v1663_v12 = vld [vmem:[#allocation6 + $0x8] sm:$0xff]  ;;  %v1662_v14 = vld [vmem:[#allocation6] sm:$0xff]  ;;  %s1924_s8 = scalar_lea.hbm %s1923_s27, 64  ;;  %s1928_s24 = scalar_lea.hbm %s2547_s5, 128 }
  0x3a   : > { %1712 = vmatpush.bf16.msra.mxu2 %v1668_v2  ;;  %519 = vmatpush.bf16.msra.mxu0 %v1668_v2  ;;  %v1671_v13 = vld [vmem:[#allocation6 + $0x48] sm:$0xff]  ;;  %v1670_v15 = vld [vmem:[#allocation6 + $0x40] sm:$0xff]  ;;  %v284_v16 = vld [vmem:[%s2120_s13 + $0x20] sm:$0xff]  ;;  %v626_v2 = vlaneseq  ;;  %p1925_p1 = scmp.ne.s32.totalorder %s1923_s27, %s1924_s8  ;;  %p1929_p11 = scmp.lt.s32.totalorder %s1923_s27, %s2547_s5 }
  0x3b   : > { %1720 = vmatpush.bf16.msra.mxu3 %v1676_v3  ;;  %552 = vmatpush.bf16.msra.mxu1 %v1676_v3  ;;  %v285_v17 = vld [vmem:[%s2120_s13 + $0x28] sm:$0xff]  ;;  %v1684_v23 = vld [vmem:[#allocation6 + $0xb0] sm:$0xff]  ;;  %v1683_v29 = vld [vmem:[#allocation6 + $0xa8] sm:$0xff]  ;;  %p1930_p9 = scmp.lt.s32.totalorder %s1928_s24, %s1924_s8 }
  0x3c   : > { %v293_v18 = vld [vmem:[%s2120_s13 + $0x21] sm:$0xff]  ;;  %v294_v19 = vld [vmem:[%s2120_s13 + $0x29] sm:$0xff]  ;;  %v313_v21 = vpack.c.bf16 %v285_v17, %v284_v16  ;;  %v287_v33 = vld [vmem:[%s2120_s13 + $0x38] sm:$0xff]  ;;  %p1926_p4 = pnand %p1925_p1, %p2086_p3 }
  0x3d   : > { %v1685_v20 = vld [vmem:[#allocation6 + $0xb8] sm:$0xff]  ;;  %v314_v22 = vpack.c.bf16 %v294_v19, %v293_v18  ;;  %v1682_v31 = vld [vmem:[#allocation6 + $0xa0] sm:$0xff]  ;;  %v1680_v39 = vld [vmem:[#allocation6 + $0x90] sm:$0xff]  ;;  %p1931_p2 = por %p1930_p9, %p1929_p11 }
  0x3e   : > { %1713 = vmatpush.bf16.msra.mxu2 %v1667_v4  ;;  %520 = vmatpush.bf16.msra.mxu0 %v1667_v4  ;;  %v280_v24 = vld [vmem:[%s2120_s13] sm:$0xff]  ;;  %v281_v25 = vld [vmem:[%s2120_s13 + $0x8] sm:$0xff]  ;;  %v286_v32 = vld [vmem:[%s2120_s13 + $0x30] sm:$0xff]  ;;  %v2157_v4 = vshrl.u32 %v626_v2, 7  ;;  %p1927_p8 = pneg %p1926_p4 }
  0x3f   : > { %1721 = vmatpush.bf16.msra.mxu3 %v1675_v5  ;;  %553 = vmatpush.bf16.msra.mxu1 %v1675_v5  ;;  %v307_v26 = vpack.c.bf16 %v281_v25, %v280_v24  ;;  %v289_v27 = vld [vmem:[%s2120_s13 + $0x1] sm:$0xff]  ;;  %v290_v28 = vld [vmem:[%s2120_s13 + $0x9] sm:$0xff]  ;;  %v295_v34 = vld [vmem:[%s2120_s13 + $0x31] sm:$0xff]  ;;  %v316_v37 = vpack.c.bf16 %v287_v33, %v286_v32 }
  0x40   : > { %v308_v30 = vpack.c.bf16 %v290_v28, %v289_v27  ;;  %v296_v35 = vld [vmem:[%s2120_s13 + $0x39] sm:$0xff]  ;;  %v282_v40 = vld [vmem:[%s2120_s13 + $0x10] sm:$0xff]  ;;  %v297_v49 = vld [vmem:[%s2120_s13 + $0x41] sm:$0x3f]  ;;  %v2173_v17 = vadd.s32 8, %v2157_v4  ;;  %v1986_v27 = vmov 0   ;;  %p1932_p10 = pnand %p1931_p2, %p1927_p8 }
  0x41   : > { %v1681_v36 = vld [vmem:[#allocation6 + $0x98] sm:$0xff]  ;;  %v317_v38 = vpack.c.bf16 %v296_v35, %v295_v34  ;;  %v283_v41 = vld [vmem:[%s2120_s13 + $0x18] sm:$0xff]  ;;  %v1678_v47 = vld [vmem:[#allocation6 + $0x80] sm:$0xff]  ;;  %v320_v51 = vpack.c.bf16 %v297_v49, %v297_v49 }
  0x42   : > { %1714 = vmatpush.bf16.msra.mxu2 %v1666_v6  ;;  %521 = vmatpush.bf16.msra.mxu0 %v1666_v6  ;;  %v291_v42 = vld [vmem:[%s2120_s13 + $0x11] sm:$0xff]  ;;  %v310_v43 = vpack.c.bf16 %v283_v41, %v282_v40  ;;  %v292_v44 = vld [vmem:[%s2120_s13 + $0x19] sm:$0xff]  ;;  %v298_v52 = vld [vmem:[%s2120_s13 + $0x2] sm:$0xff]  ;;  %v639_v6 = vand.u32 65535, %v2157_v4  ;;  %v669_v24 = vshrl.u32 %v2173_v17, 16 }
  0x43   : > { %1722 = vmatpush.bf16.msra.mxu3 %v1674_v7  ;;  %554 = vmatpush.bf16.msra.mxu1 %v1674_v7  ;;  %v1679_v45 = vld [vmem:[#allocation6 + $0x88] sm:$0xff]  ;;  %v311_v46 = vpack.c.bf16 %v292_v44, %v291_v42  ;;  %v288_v48 = vld [vmem:[%s2120_s13 + $0x40] sm:$0x3f]  ;;  %v1690_v34 = vld [vmem:[#allocation8 + $0x20] sm:$0xff] }
  0x44   : > { %v319_v50 = vpack.c.bf16 %v288_v48, %v288_v48  ;;  %v299_v53 = vld [vmem:[%s2120_s13 + $0xa] sm:$0xff]  ;;  %v300_v55 = vld [vmem:[%s2120_s13 + $0x12] sm:$0xff]  ;;  %v301_v56 = vld [vmem:[%s2120_s13 + $0x1a] sm:$0xff] }
  0x45   : > { %v309_v54 = vpack.c.bf16 %v299_v53, %v298_v52  ;;  %v312_v57 = vpack.c.bf16 %v301_v56, %v300_v55  ;;  %v302_v58 = vld [vmem:[%s2120_s13 + $0x22] sm:$0xff]  ;;  %v303_v59 = vld [vmem:[%s2120_s13 + $0x2a] sm:$0xff]  ;;  %v304_v61 = vld [vmem:[%s2120_s13 + $0x32] sm:$0xff] }
  0x46   : > { %1715 = vmatpush.bf16.msra.mxu2 %v1665_v8  ;;  %522 = vmatpush.bf16.msra.mxu0 %v1665_v8  ;;  %v315_v60 = vpack.c.bf16 %v303_v59, %v302_v58  ;;  %v305_v62 = vld [vmem:[%s2120_s13 + $0x3a] sm:$0xff]  ;;  %v306_v0 = vld [vmem:[%s2120_s13 + $0x42] sm:$0x3f]  ;;  %v2163_v7 = vld [vmem:[%s2545_s3] ss:$0 sm:$0xff]  ;;  %v640_v8 = vshrl.u32 %v2157_v4, 16 }
  0x47   : > { %1723 = vmatpush.bf16.msra.mxu3 %v1673_v9  ;;  %555 = vmatpush.bf16.msra.mxu1 %v1673_v9  ;;  %v318_v63 = vpack.c.bf16 %v305_v62, %v304_v61  ;;  %v321_v1 = vpack.c.bf16 %v306_v0, %v306_v0  ;;  %v1693_v3 = vld [vmem:[#allocation8 + $0x38] sm:$0xff]  ;;  %v1692_v5 = vld [vmem:[#allocation8 + $0x30] sm:$0xff]  ;;  %v2166_v9 = vmul.u32 58254, %v639_v6  ;;  %v1691_v19 = vld [vmem:[#allocation8 + $0x28] sm:$0xff] }
  0x48   : > { %v645_v25 = vmul.u32 58254, %v640_v8  ;;  %v1698_v44 = vld [vmem:[#allocation8 + $0x60] sm:$0xff]  ;;  %v1697_v56 = vld [vmem:[#allocation8 + $0x58] sm:$0xff] }
  0x4a   : > { %1716 = vmatpush.bf16.msra.mxu2 %v1664_v10  ;;  %523 = vmatpush.bf16.msra.mxu0 %v1664_v10  ;;  %v1701_v10 = vld [vmem:[#allocation8 + $0x78] sm:$0xff] }
  0x4b   : > { %1724 = vmatpush.bf16.msra.mxu3 %v1672_v11  ;;  %556 = vmatpush.bf16.msra.mxu1 %v1672_v11  ;;  %v2168_v11 = vmul.u32 14564, %v640_v8  ;;  %v1696_v8 = vld [vmem:[#allocation8 + $0x50] sm:$0xff] }
  0x4e   : > { %1717 = vmatpush.bf16.msra.mxu2 %v1663_v12  ;;  %524 = vmatpush.bf16.msra.mxu0 %v1663_v12 }
  0x4f   : > { %1725 = vmatpush.bf16.msra.mxu3 %v1671_v13  ;;  %557 = vmatpush.bf16.msra.mxu1 %v1671_v13 }
  0x52   : > { %1718 = vmatpush.bf16.msra.mxu2 %v1662_v14  ;;  %525 = vmatpush.bf16.msra.mxu0 %v1662_v14  ;;  %v642_v14 = vmul.u32 14564, %v639_v6 }
  0x53   : > { %1726 = vmatpush.bf16.msra.mxu3 %v1670_v15  ;;  %558 = vmatpush.bf16.msra.mxu1 %v1670_v15  ;;  %v646_v15 = vshll.u32 %v2166_v9, 16 }
  0x55   : > { %536 = vmatmul.bf16.vlgmr.msra.gmra.mxu2 %v313_v21  ;;  %526 = vmatmul.bf16.vlgmr.msra.gmra.mxu0 %v307_v26  ;;  %v648_v21 = vshll.u32 %v2168_v11, 16  ;;  %vm650_vm0 = vc.u32 %v642_v14, %v646_v15 }
  0x56   : > { %584 = vmatpush.bf16.msrb.mxu2 %v1685_v20  ;;  %569 = vmatmul.bf16.vlgmr.msra.gmra.mxu3 %v314_v22  ;;  %v1700_v20 = vld [vmem:[#allocation8 + $0x70] sm:$0xff]  ;;  %v652_v22 = vadd.s32 %v646_v15, %v642_v14  ;;  %v651_v28 = vsel %vm650_vm0, 1, %v1986_v27  ;;  %v1689_v15 = vld [vmem:[#allocation8 + $0x18] sm:$0xff] }
  0x57   : > { %559 = vmatmul.bf16.vlgmr.msra.gmra.mxu1 %v308_v30  ;;  %1218 = vmatpush.bf16.msrb.mxu3 %v1693_v3  ;;  %v653_v40 = vadd.s32 %v651_v28, %v645_v25  ;;  %v1688_v25 = vld [vmem:[#allocation8 + $0x10] sm:$0xff] }
  0x58   : > { %1251 = vmatpush.bf16.msrb.mxu0 %v1701_v10  ;;  %vm654_vm1 = vc.u32 %v652_v22, %v648_v21  ;;  %v2204_v10 = vadd.s32 24, %v2157_v4  ;;  %v1695_v21 = vld [vmem:[#allocation8 + $0x48] sm:$0xff] }
  0x5a   : > { %585 = vmatpush.bf16.msrb.mxu2 %v1684_v23  ;;  %v668_v23 = vand.u32 65535, %v2173_v17 }
  0x5b   : > { %1219 = vmatpush.bf16.msrb.mxu3 %v1692_v5  ;;  %v1708_v5 = vld [vmem:[#allocation8 + $0xb0] sm:$0xff] }
  0x5c   : > { %1252 = vmatpush.bf16.msrb.mxu0 %v1700_v20  ;;  %v672_v26 = vmul.u32 58254, %v668_v23  ;;  %v671_v30 = vmul.u32 14564, %v668_v23  ;;  %v1707_v20 = vld [vmem:[#allocation8 + $0xa8] sm:$0xff] }
  0x5e   : > { %586 = vmatpush.bf16.msrb.mxu2 %v1683_v29  ;;  %v1699_v29 = vld [vmem:[#allocation8 + $0x68] sm:$0xff]  ;;  %v675_v35 = vshll.u32 %v672_v26, 16  ;;  %v676_v53 = vshrl.u32 %v672_v26, 16 }
  0x5f   : > { %1220 = vmatpush.bf16.msrb.mxu3 %v1691_v19 }
  0x60   : > { %1253 = vmatpush.bf16.msrb.mxu0 %v1699_v29  ;;  %vm679_vm2 = vc.u32 %v671_v30, %v675_v35  ;;  %v681_v41 = vadd.s32 %v675_v35, %v671_v30 }
  0x62   : > { %587 = vmatpush.bf16.msrb.mxu2 %v1682_v31  ;;  %v673_v31 = vmul.u32 14564, %v669_v24 }
  0x63   : > { %1221 = vmatpush.bf16.msrb.mxu3 %v1690_v34 }
  0x64   : > { %1254 = vmatpush.bf16.msrb.mxu0 %v1698_v44 }
  0x65   : > { %541 = vmatmul.bf16.gmra.mxu2 %v316_v37  ;;  %531 = vmatmul.bf16.gmra.mxu0 %v310_v43  ;;  %v674_v37 = vmul.u32 58254, %v669_v24  ;;  %v655_v43 = vsel %vm654_vm1, 1, %v1986_v27 }
  0x66   : > { %588 = vmatpush.bf16.msrb.mxu2 %v1681_v36  ;;  %574 = vmatmul.bf16.gmra.mxu3 %v317_v38  ;;  %v677_v38 = vshll.u32 %v673_v31, 16  ;;  %v657_v52 = vadd.s32 %v655_v43, %v653_v40  ;;  %v1694_v40 = vld [vmem:[#allocation8 + $0x40] sm:$0xff] }
  0x67   : > { %564 = vmatmul.bf16.gmra.mxu1 %v311_v46  ;;  %1222 = vmatpush.bf16.msrb.mxu3 %v1689_v15 }
  0x68   : > { %vm683_vm3 = vc.u32 %v681_v41, %v677_v38  ;;  %1255 = vmatpush.bf16.msrb.mxu0 %v1697_v56 }
  0x69   : > { %v684_v48 = vsel %vm683_vm3, 1, %v1986_v27 }
  0x6a   : > { %589 = vmatpush.bf16.msrb.mxu2 %v1680_v39  ;;  %v2183_v39 = vadd.s32 16, %v2157_v4 }
  0x6b   : > { %1223 = vmatpush.bf16.msrb.mxu3 %v1688_v25 }
  0x6c   : > { %v697_v46 = vand.u32 65535, %v2183_v39  ;;  %v698_v49 = vshrl.u32 %v2183_v39, 16  ;;  %1256 = vmatpush.bf16.msrb.mxu0 %v1696_v8 }
  0x6e   : > { %590 = vmatpush.bf16.msrb.mxu2 %v1679_v45  ;;  %v680_v45 = vsel %vm679_vm2, 1, %v1986_v27  ;;  %v2195_v58 = vmul.u32 14564, %v698_v49 }
  0x70   : > { %v706_v2 = vshll.u32 %v2195_v58, 16  ;;  %1257 = vmatpush.bf16.msrb.mxu0 %v1695_v21 }
  0x72   : > { %591 = vmatpush.bf16.msrb.mxu2 %v1678_v47  ;;  %v682_v47 = vadd.s32 %v680_v45, %v674_v37  ;;  %v1706_v37 = vld [vmem:[#allocation8 + $0xa0] sm:$0xff]  ;;  %v2221_v45 = vadd.s32 32, %v2157_v4 }
  0x74   : > { %v686_v55 = vadd.s32 %v684_v48, %v682_v47  ;;  %1258 = vmatpush.bf16.msrb.mxu0 %v1694_v40  ;;  %v1687_v48 = vld [vmem:[#allocation8 + $0x8] sm:$0xff] }
  0x75   : > { %546 = vmatmul.bf16.gmra.mxu2 %v319_v50  ;;  %v2192_v50 = vmul.u32 58254, %v697_v46  ;;  %1224 = vmatpush.bf16.msrb.mxu3 %v1687_v48 }
  0x76   : > { %579 = vmatmul.bf16.gmra.mxu3 %v320_v51  ;;  %v647_v51 = vshrl.u32 %v2166_v9, 16  ;;  %v687_v6 = vadd.s32 %v686_v55, %v676_v53  ;;  %v1705_v53 = vld [vmem:[#allocation8 + $0x98] sm:$0xff] }
  0x77   : > { %v704_v59 = vshll.u32 %v2192_v50, 16  ;;  %v705_v38 = vshrl.u32 %v2192_v50, 16 }
  0x78   : > { %v658_v0 = vadd.s32 %v657_v52, %v647_v51  ;;  %v756_v51 = vshrl.u32 %v2221_v45, 16  ;;  %v707_v52 = vshrl.u32 %v2195_v58, 16 }
  0x85   : > { %592 = vmatmul.bf16.vlgmr.msrb.gmra.mxu2 %v309_v54  ;;  %v1709_v54 = vld [vmem:[#allocation8 + $0xb8] sm:$0xff] }
  0x86   : > { %1284 = vmatpush.bf16.msrb.mxu1 %v1709_v54 }
  0x8a   : > { %1285 = vmatpush.bf16.msrb.mxu1 %v1708_v5  ;;  %v1686_v5 = vld [vmem:[#allocation8] sm:$0xff] }
  0x8b   : > { %1225 = vmatpush.bf16.msrb.mxu3 %v1686_v5 }
  0x8e   : > { %1286 = vmatpush.bf16.msrb.mxu1 %v1707_v20 }
  0x92   : > { %1287 = vmatpush.bf16.msrb.mxu1 %v1706_v37 }
  0x95   : > { %597 = vmatmul.bf16.gmra.mxu2 %v312_v57  ;;  %v700_v57 = vmul.u32 14564, %v697_v46 }
  0x96   : > { %1288 = vmatpush.bf16.msrb.mxu1 %v1705_v53 }
  0x97   : > { %vm708_vm4 = vc.u32 %v700_v57, %v704_v59  ;;  %v710_v9 = vadd.s32 %v704_v59, %v700_v57 }
  0x99   : > { %vm712_vm5 = vc.u32 %v710_v9, %v706_v2 }
  0xa5   : > { %602 = vmatmul.bf16.gmra.mxu2 %v315_v60 }
  0xb5   : > { %607 = vmatmul.bf16.gmra.mxu2 %v318_v63  ;;  %v649_v63 = vshrl.u32 %v2168_v11, 16  ;;  %v709_v11 = vsel %vm708_vm4, 1, %v1986_v27 }
  0xb7   : > { %v659_v14 = vadd.s32 %v658_v0, %v649_v63  ;;  %v2230_v63 = vmul.u32 14564, %v756_v51  ;;  %v2233_v0 = vadd.s32 40, %v2157_v4 }
  0xb9   : > { %v660_v34 = vshrl.u32 %v659_v14, 4  ;;  %v764_v15 = vshll.u32 %v2230_v63, 16 }
  0xbb   : > { %v661_v47 = vmul.u32 18, %v660_v34 }
  0xbd   : > { %v2236_v58 = vsub.s32 %v2157_v4, %v661_v47 }
  0xbf   : > { %vm897_vm9 = vcmp.ne.s32.totalorder %v2236_v58, 0  ;;  %vm906_vm10 = vcmp.lt.s32.totalorder %v2236_v58, 0 }
  0xc0   : > { %vm2264_vm13 = vmand %vm906_vm10, %vm897_vm9 }
  0xc5   : > { %612 = vmatmul.bf16.gmra.mxu2 %v321_v1  ;;  %v678_v1 = vshrl.u32 %v673_v31, 16  ;;  %v713_v31 = vsel %vm712_vm5, 1, %v1986_v27 }
  0xc7   : > { %v688_v19 = vadd.s32 %v687_v6, %v678_v1  ;;  %v1704_v6 = vld [vmem:[#allocation8 + $0x90] sm:$0xff] }
  0xc8   : > { %1289 = vmatpush.bf16.msrb.mxu1 %v1704_v6 }
  0xd2   : > { %v527_v46 = vpop.f32.mrf.mxu0 }
  0xd8   : > { %v537_v12 = vpop.f32.mrf.mxu2 }
  0xd9   : > { %v570_v13 = vpop.f32.mrf.mxu3  ;;  %v538_v16 = vadd.f32 %v2163_v7, %v537_v12  ;;  %v703_v12 = vmul.u32 58254, %v698_v49  ;;  %v755_v49 = vand.u32 65535, %v2221_v45 }
  0xdb   : > { %v2175_v18 = vadd.f32 %v570_v13, %v538_v16  ;;  %v726_v13 = vand.u32 65535, %v2204_v10  ;;  %v727_v16 = vshrl.u32 %v2204_v10, 16  ;;  %v711_v26 = vadd.s32 %v709_v11, %v703_v12 }
  0xdc   : > { %v784_v11 = vand.u32 65535, %v2233_v0 }
  0xdd   : > { %v2209_v22 = vmul.u32 58254, %v726_v13  ;;  %v729_v28 = vmul.u32 14564, %v726_v13  ;;  %v2211_v29 = vmul.u32 14564, %v727_v16  ;;  %v715_v41 = vadd.s32 %v713_v31, %v711_v26  ;;  %v560_v13 = vpop.f32.mrf.mxu1 }
  0xde   : > { %v732_v54 = vmul.u32 58254, %v727_v16  ;;  %v2251_v25 = vmul.u32 58254, %v784_v11  ;;  %v528_v26 = vadd.f32 %v2163_v7, %v527_v46 }
  0xdf   : > { %v735_v43 = vshll.u32 %v2211_v29, 16  ;;  %v716_v57 = vadd.s32 %v715_v41, %v705_v38  ;;  %v734_v20 = vshrl.u32 %v2209_v22, 16  ;;  %v736_v40 = vshrl.u32 %v2211_v29, 16 }
  0xe0   : > { %v539_v32 = vpop.f32.mrf.mxu2  ;;  %v791_v38 = vshll.u32 %v2251_v25, 16 }
  0xe1   : > { %v572_v33 = vpop.f32.mrf.mxu3  ;;  %v540_v36 = vadd.f32 %v2163_v7, %v539_v32  ;;  %v733_v32 = vshll.u32 %v2209_v22, 16  ;;  %v717_v14 = vadd.s32 %v716_v57, %v707_v52  ;;  %v2258_v22 = vadd.s32 48, %v2157_v4 }
  0xe3   : > { %v2185_v42 = vadd.f32 %v572_v33, %v540_v36  ;;  %v1987_v33 = vmov 0.0   ;;  %v689_v36 = vshrl.u32 %v688_v19, 4  ;;  %v739_v44 = vadd.s32 %v733_v32, %v729_v28 }
  0xe4   : > { %960 = vst [vmem:[#allocation2] sm:$0x1] %v1987_v33  ;;  %vm737_vm6 = vc.u32 %v729_v28, %v733_v32  ;;  %v785_v19 = vshrl.u32 %v2233_v0, 16  ;;  %v813_v46 = vand.u32 65535, %v2258_v22 }
  0xe5   : > { %961 = vst [vmem:[#allocation2 + $0x47] sm:$0x1] %v1987_v33  ;;  %v690_v50 = vmul.u32 18, %v689_v36  ;;  %v738_v59 = vsel %vm737_vm6, 1, %v1986_v27  ;;  %vm741_vm7 = vc.u32 %v739_v44, %v735_v43  ;;  %v718_v33 = vshrl.u32 %v717_v14, 4  ;;  %v1702_v43 = vld [vmem:[#allocation8 + $0x80] sm:$0xff] }
  0xe6   : > { %v740_v8 = vadd.s32 %v738_v59, %v732_v54  ;;  %v742_v12 = vsel %vm741_vm7, 1, %v1986_v27  ;;  %v787_v36 = vmul.u32 14564, %v784_v11  ;;  %v2269_v37 = vmul.u32 14564, %v785_v19 }
  0xe7   : > { %v2242_v9 = vsub.s32 %v2173_v17, %v690_v50  ;;  %v529_v17 = vpop.f32.mrf.mxu0  ;;  %v719_v29 = vmul.u32 18, %v718_v33  ;;  %v2311_v14 = vadd.s32 56, %v2157_v4 }
  0xe8   : > { %v542_v60 = vpop.f32.mrf.mxu2  ;;  %v744_v21 = vadd.s32 %v742_v12, %v740_v8  ;;  %v793_v52 = vshll.u32 %v2269_v37, 16  ;;  %vm2286_vm0 = vc.u32 %v787_v36, %v791_v38  ;;  %v797_v54 = vadd.s32 %v791_v38, %v787_v36 }
  0xe9   : > { %v575_v61 = vpop.f32.mrf.mxu3  ;;  %v543_v62 = vadd.f32 %v2163_v7, %v542_v60  ;;  %v2227_v60 = vmul.u32 58254, %v755_v49  ;;  %vm898_vm11 = vcmp.ne.s32.totalorder %v2242_v9, 0  ;;  %vm907_vm14 = vcmp.lt.s32.totalorder %v2242_v9, 0 }
  0xea   : > { %v745_v41 = vadd.s32 %v744_v21, %v734_v20  ;;  %v925_v47 = vadd.s32 18, %v2242_v9  ;;  %vm2281_vm15 = vmand %vm907_vm14, %vm898_vm11  ;;  %v790_v8 = vmul.u32 58254, %v785_v19  ;;  %vm799_vm2 = vc.u32 %v797_v54, %v793_v52 }
  0xeb   : > { %v2201_v3 = vadd.f32 %v575_v61, %v543_v62  ;;  %v758_v62 = vmul.u32 14564, %v755_v49  ;;  %v762_v1 = vshll.u32 %v2227_v60, 16  ;;  %v561_v49 = vadd.f32 %v560_v13, %v528_v26 }
  0xec   : > { %v746_v57 = vadd.s32 %v745_v41, %v736_v40  ;;  %v763_v59 = vshrl.u32 %v2227_v60, 16  ;;  %v934_v6 = vsel %vm2281_vm15, %v925_v47, %v2242_v9  ;;  %v2305_v60 = vsub.s32 %v2183_v39, %v719_v29 }
  0xed   : > { %vm766_vm8 = vc.u32 %v758_v62, %v762_v1  ;;  %v768_v16 = vadd.s32 %v762_v1, %v758_v62  ;;  %v2292_v62 = vmul.u32 58254, %v813_v46  ;;  %v796_v13 = vsel %vm2286_vm0, 1, %v1986_v27 }
  0xee   : > { %v767_v31 = vsel %vm766_vm8, 1, %v1986_v27  ;;  %v765_v20 = vshrl.u32 %v2230_v63, 16  ;;  %v798_v21 = vadd.s32 %v796_v13, %v790_v8  ;;  %vm2323_vm3 = vcmp.lt.s32.totalorder %v934_v6, 16 }
  0xef   : > { %vm770_vm12 = vc.u32 %v768_v16, %v764_v15  ;;  %v532_v11 = vpop.f32.mrf.mxu0  ;;  %v816_v15 = vmul.u32 14564, %v813_v46  ;;  %v820_v9 = vshll.u32 %v2292_v62, 16  ;;  %vm899_vm5 = vcmp.ne.s32.totalorder %v2305_v60, 0 }
  0xf0   : > { %v544_v23 = vpop.f32.mrf.mxu2  ;;  %v771_v48 = vsel %vm770_vm12, 1, %v1986_v27  ;;  %v843_v36 = vshrl.u32 %v2311_v14, 16  ;;  %v792_v40 = vshrl.u32 %v2251_v25, 16  ;;  %vm908_vm6 = vcmp.lt.s32.totalorder %v2305_v60, 0 }
  0xf1   : > { %v577_v24 = vpop.f32.mrf.mxu3  ;;  %v545_v30 = vadd.f32 %v2163_v7, %v544_v23  ;;  %v1703_v23 = vld [vmem:[#allocation8 + $0x88] sm:$0xff]  ;;  %vm824_vm4 = vc.u32 %v816_v15, %v820_v9  ;;  %v826_v63 = vadd.s32 %v820_v9, %v816_v15  ;;  %v926_v53 = vadd.s32 18, %v2305_v60  ;;  %vm2347_vm8 = vmand %vm908_vm6, %vm899_vm5 }
  0xf2   : > { %1290 = vmatpush.bf16.msrb.mxu1 %v1703_v23  ;;  %v842_v23 = vand.u32 65535, %v2311_v14  ;;  %v2338_v50 = vmul.u32 14564, %v843_v36  ;;  %v821_v9 = vshrl.u32 %v2292_v62, 16 }
  0xf3   : > { %v2216_v35 = vadd.f32 %v577_v24, %v545_v30  ;;  %v761_v24 = vmul.u32 58254, %v756_v51  ;;  %v924_v30 = vadd.s32 18, %v2236_v58 }
  0xf4   : > { %v851_v8 = vshll.u32 %v2338_v50, 16 }
  0xf5   : > { %v769_v44 = vadd.s32 %v767_v31, %v761_v24  ;;  %v933_v51 = vsel %vm2264_vm13, %v924_v30, %v2236_v58  ;;  %v530_v58 = vadd.f32 %v2163_v7, %v529_v17  ;;  %v747_v17 = vshrl.u32 %v746_v57, 4 }
  0xf6   : > { %1291 = vmatpush.bf16.msrb.mxu1 %v1702_v43  ;;  %vm2295_vm1 = vcmp.lt.s32.totalorder %v933_v51, 16  ;;  %v800_v30 = vsel %vm799_vm2, 1, %v1986_v27  ;;  %v845_v51 = vmul.u32 14564, %v842_v23 }
  0xf7   : > { %v748_v33 = vmul.u32 18, %v747_v17  ;;  %v802_v41 = vadd.s32 %v800_v30, %v798_v21  ;;  %v534_v52 = vpop.f32.mrf.mxu0  ;;  %vm1806_vm11 = vmpackc.low %vm2323_vm3, %vm2295_vm1 }
  0xf8   : > { %v547_v55 = vpop.f32.mrf.mxu2  ;;  %v535_v6 = vadd.f32 %v2163_v7, %v534_v52 }
  0xf9   : > { %v580_v56 = vpop.f32.mrf.mxu3  ;;  %v548_v61 = vadd.f32 %v2163_v7, %v547_v55  ;;  %v814_v55 = vshrl.u32 %v2258_v22, 16  ;;  %v2343_v54 = vsub.s32 %v2204_v10, %v748_v33  ;;  %v803_v57 = vadd.s32 %v802_v41, %v792_v40 }
  0xfb   : > { %v2239_v2 = vadd.f32 %v580_v56, %v548_v61  ;;  %v562_v56 = vpop.f32.mrf.mxu1  ;;  %v773_v61 = vadd.s32 %v771_v48, %v769_v44  ;;  %v2313_v16 = vmul.u32 14564, %v814_v55  ;;  %v819_v43 = vmul.u32 58254, %v814_v55 }
  0xfc   : > { %v563_v24 = vadd.f32 %v562_v56, %v530_v58  ;;  %v2331_v44 = vmul.u32 58254, %v842_v23  ;;  %v825_v48 = vsel %vm824_vm4, 1, %v1986_v27  ;;  %vm900_vm9 = vcmp.ne.s32.totalorder %v2343_v54, 0 }
  0xfd   : > { %v774_v39 = vadd.s32 %v773_v61, %v763_v59  ;;  %v827_v59 = vadd.s32 %v825_v48, %v819_v43  ;;  %vm909_vm12 = vcmp.lt.s32.totalorder %v2343_v54, 0 }
  0xfe   : > { %v849_v29 = vshll.u32 %v2331_v44, 16  ;;  %vm2389_vm15 = vmand %vm909_vm12, %vm900_vm9 }
  0xff   : > { %v775_v34 = vadd.s32 %v774_v39, %v765_v20 }
 0x100   : > { %v549_v28 = vpop.f32.mrf.mxu2  ;;  %vm853_vm10 = vc.u32 %v845_v51, %v849_v29 }
 0x101   : > { %v582_v32 = vpop.f32.mrf.mxu3  ;;  %v533_v28 = vadd.f32 %v2163_v7, %v532_v11  ;;  %v776_v55 = vshrl.u32 %v775_v34, 4  ;;  %v854_v23 = vsel %vm853_vm10, 1, %v1986_v27  ;;  %v823_v34 = vshrl.u32 %v2313_v16, 16 }
 0x102   : > { %v822_v32 = vshll.u32 %v2313_v16, 16 }
 0x103   : > { %v565_v46 = vpop.f32.mrf.mxu1  ;;  %v777_v11 = vmul.u32 18, %v776_v55  ;;  %v850_v55 = vshrl.u32 %v2331_v44, 16 }
 0x104   : > { %vm828_vm7 = vc.u32 %v826_v63, %v822_v32  ;;  %v566_v61 = vadd.f32 %v565_v46, %v533_v28 }
 0x105   : > { %v778_v63 = vsub.s32 %v2221_v45, %v777_v11 }
 0x107   : > { %vm910_vm2 = vcmp.lt.s32.totalorder %v778_v63, 0 }
 0x108   : > { %v593_v1 = vpop.f32.mrf.mxu2 }
 0x109   : > { %v2302_v12 = vadd.f32 %v593_v1, %v561_v49  ;;  %v2336_v49 = vadd.s32 64, %v2157_v4  ;;  %v794_v4 = vshrl.u32 %v2269_v37, 16  ;;  %v829_v1 = vsel %vm828_vm7, 1, %v1986_v27 }
 0x10a   : > { %v935_v37 = vsel %vm2347_vm8, %v926_v53, %v2305_v60  ;;  %v831_v17 = vadd.s32 %v829_v1, %v827_v59  ;;  %v848_v60 = vmul.u32 58254, %v843_v36 }
 0x10b   : > { %v617_v19 = vmax.f32 %v2302_v12, 0.0  ;;  %v871_v10 = vand.u32 65535, %v2336_v49  ;;  %v855_v12 = vadd.s32 %v849_v29, %v845_v51  ;;  %v804_v7 = vadd.s32 %v803_v57, %v794_v4 }
 0x10c   : > { %v872_v20 = vshrl.u32 %v2336_v49, 16  ;;  %vm2373_vm13 = vcmp.lt.s32.totalorder %v935_v37, 16  ;;  %v832_v36 = vadd.s32 %v831_v17, %v821_v9  ;;  %v856_v43 = vadd.s32 %v854_v23, %v848_v60 }
 0x10d   : > { %v951_v26 = vsel %vm2295_vm1, %v617_v19, 0.0  ;;  %v2371_v21 = vmul.u32 58254, %v871_v10  ;;  %vm2379_vm14 = vc.u32 %v855_v12, %v851_v8  ;;  %v874_v28 = vmul.u32 14564, %v871_v10 }
 0x10e   : > { %962 = vst [vmem:[#allocation2 + $0x1] sm:$0xff] %v951_v26  ;;  %v2384_v30 = vmul.u32 14564, %v872_v20  ;;  %v805_v33 = vshrl.u32 %v804_v7, 4  ;;  %v858_v48 = vsel %vm2379_vm14, 1, %v1986_v27  ;;  %vm901_vm1 = vcmp.ne.s32.totalorder %v778_v63, 0 }
 0x10f   : > { %v878_v31 = vshll.u32 %v2371_v21, 16  ;;  %v833_v52 = vadd.s32 %v832_v36, %v823_v34  ;;  %v860_v56 = vadd.s32 %v858_v48, %v856_v43  ;;  %v877_v4 = vmul.u32 58254, %v872_v20  ;;  %vm2410_vm5 = vmand %vm910_vm2, %vm901_vm1 }
 0x110   : > { %v595_v38 = vpop.f32.mrf.mxu2  ;;  %v880_v16 = vshll.u32 %v2384_v30, 16  ;;  %v852_v12 = vshrl.u32 %v2338_v50, 16 }
 0x111   : > { %v596_v47 = vadd.f32 %v595_v38, %v563_v24  ;;  %v567_v24 = vpop.f32.mrf.mxu1  ;;  %vm882_vm0 = vc.u32 %v874_v28, %v878_v31  ;;  %v884_v51 = vadd.s32 %v878_v31, %v874_v28  ;;  %v834_v10 = vshrl.u32 %v833_v52, 4 }
 0x112   : > { %v568_v46 = vadd.f32 %v567_v24, %v535_v6  ;;  %v861_v37 = vadd.s32 %v860_v56, %v850_v55 }
 0x113   : > { %v618_v25 = vmax.f32 %v596_v47, 0.0  ;;  %vm886_vm4 = vc.u32 %v884_v51, %v880_v16  ;;  %v835_v50 = vmul.u32 18, %v834_v10 }
 0x114   : > { %v862_v20 = vadd.s32 %v861_v37, %v852_v12 }
 0x115   : > { %v952_v58 = vsel %vm2323_vm3, %v618_v25, 0.0  ;;  %v1807_v15 = vpack.c.bf16 %v618_v25, %v617_v19  ;;  %v927_v19 = vadd.s32 18, %v2343_v54  ;;  %v971_v40 = vld [vmem:[#allocation2] sm:$0xff]  ;;  %v806_v25 = vmul.u32 18, %v805_v33 }
 0x116   : > { %963 = vst [vmem:[#allocation2 + $0x9] sm:$0xff] %v952_v58  ;;  %v836_v62 = vsub.s32 %v2258_v22, %v835_v50  ;;  %v863_v28 = vshrl.u32 %v862_v20, 4 }
 0x117   : > { %1808 = vmatmul.msk.bf16.vlgmr.msrb.gmra.mxu0 %vm1806_vm11, %v1807_v15  ;;  %v936_v45 = vsel %vm2389_vm15, %v927_v19, %v2343_v54  ;;  %v883_v54 = vsel %vm882_vm0, 1, %v1986_v27  ;;  %v807_v1 = vsub.s32 %v2233_v0, %v806_v25  ;;  %v887_v15 = vsel %vm886_vm4, 1, %v1986_v27 }
 0x118   : > { %v598_v13 = vpop.f32.mrf.mxu2  ;;  %vm2405_vm3 = vcmp.lt.s32.totalorder %v936_v45, 16  ;;  %v885_v11 = vadd.s32 %v883_v54, %v877_v4  ;;  %v879_v27 = vshrl.u32 %v2371_v21, 16  ;;  %v881_v21 = vshrl.u32 %v2384_v30, 16 }
 0x119   : > { %v2368_v39 = vadd.f32 %v598_v13, %v566_v61  ;;  %v928_v61 = vadd.s32 18, %v778_v63  ;;  %vm902_vm6 = vcmp.ne.s32.totalorder %v807_v1, 0  ;;  %vm911_vm7 = vcmp.lt.s32.totalorder %v807_v1, 0  ;;  %vm1809_vm8 = vmpackc.low %vm2405_vm3, %vm2373_vm13 }
 0x11a   : > { %v929_v23 = vadd.s32 18, %v807_v1  ;;  %vm2431_vm10 = vmand %vm911_vm7, %vm902_vm6  ;;  %vm903_vm11 = vcmp.ne.s32.totalorder %v836_v62, 0  ;;  %vm912_vm12 = vcmp.lt.s32.totalorder %v836_v62, 0  ;;  %v864_v22 = vmul.u32 18, %v863_v28 }
 0x11b   : > { %v619_v26 = vmax.f32 %v2368_v39, 0.0  ;;  %v937_v7 = vsel %vm2410_vm5, %v928_v61, %v778_v63  ;;  %v889_v39 = vadd.s32 %v887_v15, %v885_v11  ;;  %v930_v30 = vadd.s32 18, %v836_v62  ;;  %vm2446_vm14 = vmand %vm912_vm12, %vm903_vm11 }
 0x11c   : > { %vm2427_vm9 = vcmp.lt.s32.totalorder %v937_v7, 16  ;;  %v938_v63 = vsel %vm2431_vm10, %v929_v23, %v807_v1 }
 0x11d   : > { %v953_v38 = vsel %vm2373_vm13, %v619_v26, 0.0  ;;  %v972_v41 = vld [vmem:[#allocation2 + $0x8] sm:$0xff]  ;;  %v890_v31 = vadd.s32 %v889_v39, %v879_v27  ;;  %vm2442_vm13 = vcmp.lt.s32.totalorder %v938_v63, 16  ;;  %v939_v16 = vsel %vm2446_vm14, %v930_v30, %v836_v62 }
 0x11e   : > { %964 = vst [vmem:[#allocation2 + $0x11] sm:$0xff] %v953_v38  ;;  %v998_v47 = vpack.c.bf16 %v972_v41, %v971_v40  ;;  %v989_v6 = vld [vmem:[#allocation2 + $0x2] sm:$0xff]  ;;  %vm1812_vm15 = vmpackc.low %vm2442_vm13, %vm2427_vm9  ;;  %vm2460_vm2 = vcmp.lt.s32.totalorder %v939_v16, 16 }
 0x11f   : > { %v891_v36 = vadd.s32 %v890_v31, %v881_v21  ;;  %v1061_v63 = vld [vmem:[%s2120_s13 + $0x1] sm:$0xff] }
 0x120   : > { %v600_v29 = vpop.f32.mrf.mxu2  ;;  %1226 = vmatmul.bf16.vlgmr.msrb.gmra.mxu3 %v998_v47 }
 0x121   : > { %v601_v53 = vadd.f32 %v600_v29, %v568_v46  ;;  %v892_v48 = vshrl.u32 %v891_v36, 4 }
 0x123   : > { %v620_v59 = vmax.f32 %v601_v53, 0.0 }
 0x125   : > { %v954_v44 = vsel %vm2405_vm3, %v620_v59, 0.0  ;;  %v990_v8 = vld [vmem:[#allocation2 + $0xa] sm:$0xff]  ;;  %v1810_v0 = vpack.c.bf16 %v620_v59, %v619_v26 }
 0x126   : > { %965 = vst [vmem:[#allocation2 + $0x19] sm:$0xff] %v954_v44  ;;  %v1000_v13 = vpack.c.bf16 %v990_v8, %v989_v6 }
 0x127   : > { %1811 = vmatmul.msk.bf16.gmra.mxu0 %vm1809_vm8, %v1810_v0 }
 0x128   : > { %v603_v9 = vpop.f32.mrf.mxu2  ;;  %1292 = vmatmul.bf16.vlgmr.msrb.gmra.mxu1 %v1000_v13 }
 0x129   : > { %v604_v17 = vadd.f32 %v603_v9, %v2175_v18  ;;  %v973_v18 = vld [vmem:[#allocation2 + $0x10] sm:$0xff] }
 0x12b   : > { %v621_v19 = vmax.f32 %v604_v17, 0.0 }
 0x12d   : > { %v955_v24 = vsel %vm2427_vm9, %v621_v19, 0.0  ;;  %v974_v26 = vld [vmem:[#allocation2 + $0x18] sm:$0xff] }
 0x12e   : > { %966 = vst [vmem:[#allocation2 + $0x21] sm:$0xff] %v955_v24  ;;  %v1001_v32 = vpack.c.bf16 %v974_v26, %v973_v18  ;;  %v991_v46 = vld [vmem:[#allocation2 + $0x12] sm:$0xff]  ;;  %v2474_v18 = vld [vmem:[%s2546_s4] ss:$0 sm:$0xff] }
 0x130   : > { %v605_v33 = vpop.f32.mrf.mxu2  ;;  %1231 = vmatmul.bf16.gmra.mxu3 %v1001_v32 }
 0x131   : > { %v606_v34 = vadd.f32 %v605_v33, %v2185_v42  ;;  %v865_v42 = vsub.s32 %v2311_v14, %v864_v22  ;;  %v893_v14 = vmul.u32 18, %v892_v48 }
 0x133   : > { %v622_v40 = vmax.f32 %v606_v34, 0.0  ;;  %vm904_vm0 = vcmp.ne.s32.totalorder %v865_v42, 0  ;;  %vm913_vm1 = vcmp.lt.s32.totalorder %v865_v42, 0  ;;  %v931_v55 = vadd.s32 18, %v865_v42 }
 0x134   : > { %vm922_vm3 = vmand %vm913_vm1, %vm904_vm0  ;;  %v894_v54 = vsub.s32 %v2336_v49, %v893_v14 }
 0x135   : > { %v956_v43 = vsel %vm2442_vm13, %v622_v40, 0.0  ;;  %v992_v47 = vld [vmem:[#allocation2 + $0x1a] sm:$0xff]  ;;  %v1813_v29 = vpack.c.bf16 %v622_v40, %v621_v19 }
 0x136   : > { %967 = vst [vmem:[#allocation2 + $0x29] sm:$0xff] %v956_v43  ;;  %v1003_v45 = vpack.c.bf16 %v992_v47, %v991_v46  ;;  %v975_v4 = vld [vmem:[#allocation2 + $0x20] sm:$0xff]  ;;  %vm905_vm4 = vcmp.ne.s32.totalorder %v894_v54, 0  ;;  %vm914_vm5 = vcmp.lt.s32.totalorder %v894_v54, 0  ;;  %v932_v10 = vadd.s32 18, %v894_v54 }
 0x137   : > { %1814 = vmatmul.msk.bf16.gmra.mxu0 %vm1812_vm15, %v1813_v29  ;;  %vm923_vm7 = vmand %vm914_vm5, %vm905_vm4  ;;  %v1062_v43 = vld [vmem:[%s2120_s13 + $0x9] sm:$0xff] }
 0x138   : > { %v608_v51 = vpop.f32.mrf.mxu2  ;;  %1297 = vmatmul.bf16.gmra.mxu1 %v1003_v45  ;;  %v941_v37 = vsel %vm923_vm7, %v932_v10, %v894_v54 }
 0x139   : > { %v609_v25 = vadd.f32 %v608_v51, %v2201_v3  ;;  %v940_v3 = vsel %vm922_vm3, %v931_v55, %v865_v42  ;;  %vm950_vm9 = vcmp.lt.s32.totalorder %v941_v37, 16 }
 0x13a   : > { %vm949_vm6 = vcmp.lt.s32.totalorder %v940_v3, 16 }
 0x13b   : > { %v623_v53 = vmax.f32 %v609_v25, 0.0  ;;  %vm1815_vm8 = vmpackc.low %vm949_vm6, %vm2460_vm2  ;;  %v1063_v25 = vld [vmem:[%s2120_s13 + $0x11] sm:$0xff] }
 0x13d   : > { %v957_v56 = vsel %vm2460_vm2, %v623_v53, 0.0  ;;  %v976_v57 = vld [vmem:[#allocation2 + $0x28] sm:$0xff] }
 0x13e   : > { %968 = vst [vmem:[#allocation2 + $0x31] sm:$0xff] %v957_v56  ;;  %v1004_v59 = vpack.c.bf16 %v976_v57, %v975_v4  ;;  %v993_v6 = vld [vmem:[#allocation2 + $0x22] sm:$0xff] }
 0x140   : > { %v610_v61 = vpop.f32.mrf.mxu2  ;;  %1236 = vmatmul.bf16.gmra.mxu3 %v1004_v59  ;;  %v1064_v59 = vld [vmem:[%s2120_s13 + $0x19] sm:$0xff] }
 0x141   : > { %v611_v58 = vadd.f32 %v610_v61, %v2216_v35 }
 0x143   : > { %v624_v1 = vmax.f32 %v611_v58, 0.0 }
 0x145   : > { %v958_v44 = vsel %vm949_vm6, %v624_v1, 0.0  ;;  %v994_v8 = vld [vmem:[#allocation2 + $0x2a] sm:$0xff]  ;;  %v1816_v11 = vpack.c.bf16 %v624_v1, %v623_v53 }
 0x146   : > { %969 = vst [vmem:[#allocation2 + $0x39] sm:$0xff] %v958_v44  ;;  %v1006_v12 = vpack.c.bf16 %v994_v8, %v993_v6  ;;  %v977_v7 = vld [vmem:[#allocation2 + $0x30] sm:$0xff] }
 0x147   : > { %1817 = vmatmul.msk.bf16.gmra.mxu0 %vm1815_vm8, %v1816_v11 }
 0x148   : > { %v613_v49 = vpop.f32.mrf.mxu2  ;;  %1302 = vmatmul.bf16.gmra.mxu1 %v1006_v12  ;;  %v1065_v12 = vld [vmem:[%s2120_s13 + $0x21] sm:$0xff] }
 0x149   : > { %v614_v35 = vadd.f32 %v613_v49, %v2239_v2 }
 0x14b   : > { %v625_v13 = vmax.f32 %v614_v35, 0.0 }
 0x14d   : > { %v959_v15 = vsel %vm950_vm9, %v625_v13, 0.0  ;;  %v978_v9 = vld [vmem:[#allocation2 + $0x38] sm:$0xff] }
 0x14e   : > { %970 = vst [vmem:[#allocation2 + $0x41] sm:$0x3f] %v959_v15  ;;  %v1007_v0 = vpack.c.bf16 %v978_v9, %v977_v7  ;;  %v995_v17 = vld [vmem:[#allocation2 + $0x32] sm:$0xff] }
 0x150   : > { %v615_v50 = vpop.f32.mrf.mxu2  ;;  %1241 = vmatmul.bf16.gmra.mxu3 %v1007_v0  ;;  %v1066_v0 = vld [vmem:[%s2120_s13 + $0x29] sm:$0xff] }
 0x155   : > { %v996_v20 = vld [vmem:[#allocation2 + $0x3a] sm:$0xff]  ;;  %v997_v23 = vld [vmem:[#allocation2 + $0x42] sm:$0x3f] }
 0x156   : > { %v988_v27 = vld [vmem:[#allocation2 + $0x41] sm:$0x3f]  ;;  %v1009_v39 = vpack.c.bf16 %v996_v20, %v995_v17  ;;  %v1012_v5 = vpack.c.bf16 %v997_v23, %v997_v23 }
 0x157   : > { %v1011_v60 = vpack.c.bf16 %v988_v27, %v988_v27  ;;  %v979_v19 = vld [vmem:[#allocation2 + $0x40] sm:$0x3f] }
 0x158   : > { %1307 = vmatmul.bf16.gmra.mxu1 %v1009_v39  ;;  %v1010_v2 = vpack.c.bf16 %v979_v19, %v979_v19  ;;  %v1067_v23 = vld [vmem:[%s2120_s13 + $0x31] sm:$0xff] }
 0x159   : > { %1279 = vmatmul.bf16.gmra.mxu0 %v1011_v60 }
 0x160   : > { %1246 = vmatmul.bf16.gmra.mxu3 %v1010_v2 }
 0x168   : > { %1312 = vmatmul.bf16.gmra.mxu1 %v1012_v5 }
 0x194   : > { %v1260_v62 = vpop.f32.mrf.mxu0 }
 0x19c   : > { %v1262_v24 = vpop.f32.mrf.mxu0 }
 0x1a3   : > { %v1227_v26 = vpop.f32.mrf.mxu3 }
 0x1a4   : > { %v1228_v28 = vadd.f32 %v2474_v18, %v1227_v26  ;;  %v1265_v31 = vpop.f32.mrf.mxu0 }
 0x1a5   : > { %v1293_v21 = vpop.f32.mrf.mxu1 }
 0x1a6   : > { %v1261_v32 = vadd.f32 %v1260_v62, %v1228_v28 }
 0x1a8   : > { %v1294_v33 = vadd.f32 %v1293_v21, %v1261_v32 }
 0x1aa   : > { %v1317_v34 = vadd.f32 %v1294_v33, %v1061_v63  ;;  %v1068_v63 = vld [vmem:[%s2120_s13 + $0x39] sm:$0xff] }
 0x1ab   : > { %v1229_v22 = vpop.f32.mrf.mxu3 }
 0x1ac   : > { %v1326_v36 = vmax.f32 %v1317_v34, 0.0  ;;  %v1230_v38 = vadd.f32 %v2474_v18, %v1229_v22  ;;  %v1267_v30 = vpop.f32.mrf.mxu0 }
 0x1ad   : > { %v1295_v40 = vpop.f32.mrf.mxu1 }
 0x1ae   : > { %1335 = vst [vmem:[%s2480_s12] sm:$0xff] %v1326_v36  ;;  %v1263_v41 = vadd.f32 %v1262_v24, %v1230_v38 }
 0x1b0   : > { %v1296_v46 = vadd.f32 %v1295_v40, %v1263_v41  ;;  %v1069_v41 = vld [vmem:[%s2120_s13 + $0x41] sm:$0x3f] }
 0x1b2   : > { %v1318_v47 = vadd.f32 %v1296_v46, %v1062_v43 }
 0x1b3   : > { %v1232_v42 = vpop.f32.mrf.mxu3 }
 0x1b4   : > { %v1327_v48 = vmax.f32 %v1318_v47, 0.0  ;;  %v1233_v45 = vadd.f32 %v2474_v18, %v1232_v42  ;;  %v1270_v51 = vpop.f32.mrf.mxu0 }
 0x1b5   : > { %v1298_v16 = vpop.f32.mrf.mxu1 }
 0x1b6   : > { %1336 = vst [vmem:[%s2480_s12 + $0x8] sm:$0xff] %v1327_v48  ;;  %v1266_v29 = vadd.f32 %v1265_v31, %v1233_v45 }
 0x1b8   : > { %v1299_v14 = vadd.f32 %v1298_v16, %v1266_v29 }
 0x1ba   : > { %v1319_v52 = vadd.f32 %v1299_v14, %v1063_v25 }
 0x1bb   : > { %v1234_v53 = vpop.f32.mrf.mxu3 }
 0x1bc   : > { %v1328_v55 = vmax.f32 %v1319_v52, 0.0  ;;  %v1235_v56 = vadd.f32 %v2474_v18, %v1234_v53  ;;  %v1272_v57 = vpop.f32.mrf.mxu0 }
 0x1bd   : > { %v1300_v4 = vpop.f32.mrf.mxu1 }
 0x1be   : > { %1337 = vst [vmem:[%s2480_s12 + $0xe] sm:$0xfc] %v1328_v55  ;;  %v1268_v54 = vadd.f32 %v1267_v30, %v1235_v56 }
 0x1c0   : > { %v1301_v3 = vadd.f32 %v1300_v4, %v1268_v54 }
 0x1c2   : > { %v1320_v61 = vadd.f32 %v1301_v3, %v1064_v59 }
 0x1c3   : > { %v1237_v58 = vpop.f32.mrf.mxu3 }
 0x1c4   : > { %v1329_v1 = vmax.f32 %v1320_v61, 0.0  ;;  %v1238_v10 = vadd.f32 %v2474_v18, %v1237_v58  ;;  %v1275_v6 = vpop.f32.mrf.mxu0 }
 0x1c5   : > { %v1303_v44 = vpop.f32.mrf.mxu1 }
 0x1c6   : > { %1338 = vst [vmem:[%s2480_s12 + $0x16] sm:$0xff] %v1329_v1  ;;  %v1271_v8 = vadd.f32 %v1270_v51, %v1238_v10 }
 0x1c8   : > { %v1304_v37 = vadd.f32 %v1303_v44, %v1271_v8 }
 0x1ca   : > { %v1321_v49 = vadd.f32 %v1304_v37, %v1065_v12 }
 0x1cb   : > { %v1239_v11 = vpop.f32.mrf.mxu3 }
 0x1cc   : > { %v1330_v35 = vmax.f32 %v1321_v49, 0.0  ;;  %v1240_v13 = vadd.f32 %v2474_v18, %v1239_v11  ;;  %v1277_v7 = vpop.f32.mrf.mxu0 }
 0x1cd   : > { %v1305_v15 = vpop.f32.mrf.mxu1 }
 0x1ce   : > { %1339 = vst [vmem:[%s2480_s12 + $0x1e] sm:$0x3] %v1330_v35  ;;  %v1273_v9 = vadd.f32 %v1272_v57, %v1240_v13 }
 0x1cf   : > { %1340 = vst [vmem:[%s2480_s12 + $0x1c] sm:$0xf0] %v1330_v35 }
 0x1d0   : > { %v1306_v50 = vadd.f32 %v1305_v15, %v1273_v9 }
 0x1d2   : > { %v1322_v17 = vadd.f32 %v1306_v50, %v1066_v0 }
 0x1d3   : > { %v1242_v20 = vpop.f32.mrf.mxu3 }
 0x1d4   : > { %v1331_v27 = vmax.f32 %v1322_v17, 0.0  ;;  %v1243_v39 = vadd.f32 %v2474_v18, %v1242_v20 }
 0x1d5   : > { %v1308_v60 = vpop.f32.mrf.mxu1 }
 0x1d6   : > { %v1280_v19 = vpop.f32.mrf.mxu0  ;;  %1341 = vst [vmem:[%s2480_s12 + $0x24] sm:$0xff] %v1331_v27  ;;  %v1276_v2 = vadd.f32 %v1275_v6, %v1243_v39 }
 0x1d8   : > { %v1309_v5 = vadd.f32 %v1308_v60, %v1276_v2 }
 0x1da   : > { %v1323_v62 = vadd.f32 %v1309_v5, %v1067_v23 }
 0x1db   : > { %v1244_v24 = vpop.f32.mrf.mxu3 }
 0x1dc   : > { %v1332_v26 = vmax.f32 %v1323_v62, 0.0  ;;  %v1245_v28 = vadd.f32 %v2474_v18, %v1244_v24 }
 0x1dd   : > { %v1310_v21 = vpop.f32.mrf.mxu1 }
 0x1de   : > { %v1282_v31 = vpop.f32.mrf.mxu0  ;;  %1342 = vst [vmem:[%s2480_s12 + $0x2c] sm:$0xf] %v1332_v26  ;;  %v1278_v32 = vadd.f32 %v1277_v7, %v1245_v28 }
 0x1df   : > { %1343 = vst [vmem:[%s2480_s12 + $0x2a] sm:$0xc0] %v1332_v26 }
 0x1e0   : > { %v1311_v33 = vadd.f32 %v1310_v21, %v1278_v32 }
 0x1e2   : > { %v1324_v34 = vadd.f32 %v1311_v33, %v1068_v63 }
 0x1e3   : > { %v1247_v22 = vpop.f32.mrf.mxu3 }
 0x1e4   : > { %v1333_v36 = vmax.f32 %v1324_v34, 0.0  ;;  %v1248_v38 = vadd.f32 %v2474_v18, %v1247_v22 }
 0x1e5   : > { %v1313_v40 = vpop.f32.mrf.mxu1 }
 0x1e6   : > { %1344 = vst [vmem:[%s2480_s12 + $0x32] sm:$0xff] %v1333_v36  ;;  %v1281_v30 = vadd.f32 %v1280_v19, %v1248_v38 }
 0x1e8   : > { %v1314_v43 = vadd.f32 %v1313_v40, %v1281_v30 }
 0x1ea   : > { %v1325_v46 = vadd.f32 %v1314_v43, %v1069_v41 }
 0x1eb   : > { %v1249_v47 = vpop.f32.mrf.mxu3 }
 0x1ec   : > { %v1334_v42 = vmax.f32 %v1325_v46, 0.0 }
 0x1ed   : > { %v1315_v48 = vpop.f32.mrf.mxu1 }
 0x1ee   : > { %1345 = vst [vmem:[%s2480_s12 + $0x3a] sm:$0x3f] %v1334_v42 }
 0x1ef   : > { %1935 = shalt.err (!%p1932_p10)
}
 0x1f0   : > { %s1988_s1 = smov 128   ;;  %s1989_s10 = smov 8  }
 0x1f1   : > { %1739 = dma.vmem_to_hbm [thread:$0]  (%p2086_p3), %s1360_s28, 1024, %s1362_s26, %s1347_s22, %s1988_s1, %s1988_s1, %s1989_s10  }
 0x1f2 PF: > { %s1376_s11 = sand.u32 1, %s1966_s18   ;;  %p2587_p12 = scmp.ge.s32.totalorder %s1978_s21, 2 }
 0x1f3   : > { %s1377_s12 = scalar_lea.sflag [#allocation5], %s1376_s11 }
 0x1f4   : > { %p1753_p13 = pnand %p2587_p12, %p2055_p6 }
 0x1f6   : > { %p1754_p0 = pneg %p1753_p13 }
 0x1f8   : > { %1961 = dma.done.wait (%p1754_p0), %s1377_s12, 1024  }
 0x1f9   : > { %1963 = vsyncadd (%p1754_p0), %s1377_s12, 4294966272  ;;  %p19_p5 = scmp.ge.s32.totalorder %s2076_s14, 4   ;;  %s2588_s18 = smov %s1970_s19 }
 0x1fa   : > { %s2589_s19 = smov %s1974_s20  ;;  %s2590_s20 = smov %s2092_s23 }
 0x1fb   : > { %s2591_s21 = smov %s2076_s14  ;;  %21 = sbr.rel (!%p19_p5) target bundleno = 8 (0x8), region = 93 }
 0x200   :  { %1383 = vsyncpa [#allocation4], 1 }
 0x201   :  { %1385 = vsyncpa [#allocation4 + $0x1], 1 }
 0x202   :  { %1386 = vsyncpa [#allocation7], 1 }
 0x203   :  { %1387 = vsyncpa [#allocation5], 1 }
 0x204   :  { %1389 = vsyncpa [#allocation5 + $0x1], 1 }

</bundles_post_ra>
